<compile_context>
chip_gen: v6e
topology: v6e:2x2x1
jax: 0.10.0
libtpu: 0.0.40
codegen_flags: <defaults>
</compile_context>

<pallas_src>
import functools

import jax
import jax.numpy as jnp
from jax.experimental import pallas as pl
from jax.experimental.pallas import tpu as pltpu


def _mlp_mean_log_std_kernel(
    xt_ref,            # (D_in, TM)  compute dtype  (rows on the 128-lane axis)
    w1t_ref, b1t_ref,  # (H, D_in)   compute dtype, (H, 1)   f32
    w2t_ref, b2t_ref,  # (H, H)      compute dtype, (H, 1)   f32
    wht_ref, bht_ref,  # (2*O, H)    compute dtype, (2*O, 1) f32  (fused heads)
    out_ref,           # (2*O, TM)   f32: rows = [means | log_stds], cols = samples
):
    cdt = w1t_ref.dtype
    xt = xt_ref[...]

    # fc1 + relu: MXU accumulates in f32, bias-add/ReLU in f32 on the VPU.
    h1 = jnp.dot(w1t_ref[...], xt, preferred_element_type=jnp.float32) + b1t_ref[...]
    h1 = jnp.maximum(h1, 0.0).astype(cdt)

    # fc2 + relu
    h2 = jnp.dot(w2t_ref[...], h1, preferred_element_type=jnp.float32) + b2t_ref[...]
    h2 = jnp.maximum(h2, 0.0).astype(cdt)

    # fused mean || log_std head -> single lane-dense full-block store
    out = jnp.dot(wht_ref[...], h2, preferred_element_type=jnp.float32) + bht_ref[...]
    out_ref[...] = out.astype(out_ref.dtype)


def _round_up(a, b):
    return (a + b - 1) // b * b


def _vmem_capacity_bytes():
    try:
        return int(pltpu.get_tpu_info().vmem_capacity_bytes)
    except Exception:
        return 64 * 1024 * 1024  # conservative fallback (v7x per-TC VMEM)


@functools.partial(jax.jit, static_argnames=("tile_rows", "use_bf16"))
def mlp_mean_log_std_agent_forward(
    inputs, hidden_states, params, *, tile_rows=None, use_bf16=False
):
    """inputs: (batch, n_agents, input_shape) float32.

    Returns (means_log_stds (batch, n_agents, 2*n_net_outputs), hidden_states).

    tile_rows=None picks a generation-aware default (8192 on v7x-class VMEM,
    16384 on v5e/v6e).  use_bf16=True halves the input/weight streams
    (recommended on v5e); accumulation stays f32.
    """
    batch_size, n_agents, d_in = inputs.shape
    m = batch_size * n_agents

    w1, b1, w2, b2, wm, bm, ws, bs = params
    hidden = w1.shape[1]
    n_out = wm.shape[1]
    two_out = 2 * n_out

    # Generation-aware tiling / VMEM limit (trace-time hardware query).
    vmem_cap = _vmem_capacity_bytes()
    small_vmem = vmem_cap <= 64 * 1024 * 1024          # v7x: 64 MiB per TC
    if tile_rows is None:
        tile_rows = 8192 if small_vmem else 16384      # v5e/v6e: 128 MiB VMEM
    vmem_limit = (40 if small_vmem else 96) * 1024 * 1024

    compute_dtype = jnp.bfloat16 if use_bf16 else jnp.float32
    itemsize = 2 if use_bf16 else 4

    # Lane-dense / transposed operands: rows on the 128-lane axis.
    xt = inputs.reshape(m, d_in).T.astype(compute_dtype)              # (D_in, m)
    w1t = w1.T.astype(compute_dtype)                                  # (H, D_in)
    w2t = w2.T.astype(compute_dtype)                                  # (H, H)
    wht = jnp.concatenate([wm, ws], axis=1).T.astype(compute_dtype)   # (2*O, H)
    # Biases stay f32 (f32 VPU math; v5e's VPU has no bf16 anyway).
    b1t = b1.reshape(hidden, 1).astype(jnp.float32)
    b2t = b2.reshape(hidden, 1).astype(jnp.float32)
    bht = jnp.concatenate([bm, bs], axis=1).reshape(two_out, 1).astype(jnp.float32)

    # Row-tile selection (lane axis):
    #   * block last dim must be a multiple of 128 OR span the whole row axis;
    #   * cap so a large m yields >= 2 grid steps (v7x megacore row split);
    #   * NO host-side padding: ragged tail handled by Pallas (masked writes).
    tr = _round_up(max(int(tile_rows), 128), 128)
    if m <= tr:
        tm = m                                          # single full-span block
    else:
        tm = min(tr, _round_up(pl.cdiv(m, 2), 128))     # >= 2 steps
    grid = (pl.cdiv(m, tm),)

    const = lambda i: (0, 0)  # weights/biases: same block every step (VMEM-resident)

    cost = pl.CostEstimate(
        flops=2 * m * (d_in * hidden + hidden * hidden + hidden * two_out),
        transcendentals=0,
        bytes_accessed=(
            m * d_in * itemsize                              # x^T stream in
            + m * two_out * 4                                # out stream
            + (w1t.size + w2t.size + wht.size) * itemsize    # resident weights
            + (b1t.size + b2t.size + bht.size) * 4           # resident biases
        ),
    )

    out_t = pl.pallas_call(
        _mlp_mean_log_std_kernel,
        out_shape=jax.ShapeDtypeStruct((two_out, m), jnp.float32),
        grid=grid,
        in_specs=[
            pl.BlockSpec((d_in, tm), lambda i: (0, i)),   # x^T (streamed, lane-dense)
            pl.BlockSpec((hidden, d_in), const),          # w1^T
            pl.BlockSpec((hidden, 1), const),             # b1
            pl.BlockSpec((hidden, hidden), const),        # w2^T
            pl.BlockSpec((hidden, 1), const),             # b2
            pl.BlockSpec((two_out, hidden), const),       # fused head weights^T
            pl.BlockSpec((two_out, 1), const),            # fused head bias
        ],
        out_specs=pl.BlockSpec((two_out, tm), lambda i: (0, i)),
        compiler_params=pltpu.CompilerParams(
            dimension_semantics=("parallel",),            # rows across TCs on v7x
            vmem_limit_bytes=vmem_limit,
        ),
        cost_estimate=cost,
    )(xt, w1t, b1t, w2t, b2t, wht, bht)

    # Cheap relayout of the (2*O, m) lane-dense result back to module layout.
    means_log_stds = out_t.T.reshape(batch_size, n_agents, two_out)
    return means_log_stds, hidden_states


def init_params(key, input_shape, hidden_dim, n_net_outputs):
    """Mimic PyTorch nn.Linear default init (U[-1/sqrt(fan_in), 1/sqrt(fan_in)]).
    Weights stored as (in, out) so the reference does x @ W."""
    def linear(key, fan_in, fan_out):
        kw, kb = jax.random.split(key)
        bound = 1.0 / jnp.sqrt(fan_in)
        w = jax.random.uniform(kw, (fan_in, fan_out), jnp.float32, -bound, bound)
        b = jax.random.uniform(kb, (1, fan_out), jnp.float32, -bound, bound)
        return w, b

    k1, k2, k3, k4 = jax.random.split(key, 4)
    w1, b1 = linear(k1, input_shape, hidden_dim)
    w2, b2 = linear(k2, hidden_dim, hidden_dim)
    wm, bm = linear(k3, hidden_dim, n_net_outputs)
    ws, bs = linear(k4, hidden_dim, n_net_outputs)
    return (w1, b1, w2, b2, wm, bm, ws, bs)


def _reference_forward(inputs, hidden_states, params):
    """Pure-JAX reference matching the PyTorch module semantics."""
    w1, b1, w2, b2, wm, bm, ws, bs = params
    b, a, _ = inputs.shape
    x = inputs.reshape(b * a, -1)
    h1 = jnp.maximum(x @ w1 + b1, 0.0)
    h2 = jnp.maximum(h1 @ w2 + b2, 0.0)
    means = (h2 @ wm + bm).reshape(b, a, -1)
    log_stds = (h2 @ ws + bs).reshape(b, a, -1)
    return jnp.concatenate([means, log_stds], axis=-1), hidden_states


if __name__ == "__main__":
    batch_size = 2
    n_agents = 3
    input_shape = 16
    hidden_dim = 32
    n_net_outputs = 8

    key = jax.random.PRNGKey(0)
    k_in, k_params, k_big = jax.random.split(key, 3)

    inputs = jax.random.normal(
        k_in, (batch_size, n_agents, input_shape), dtype=jnp.float32
    )
    # init_hidden(): zeros of shape (1, hidden_dim) per the module
    hidden_states = jnp.zeros((1, hidden_dim), dtype=jnp.float32)
    params = init_params(k_params, input_shape, hidden_dim, n_net_outputs)

    # --- 1) tiny, single full-span block, f32, default generation-aware tiling ---
    out, hs = mlp_mean_log_std_agent_forward(inputs, hidden_states, params)
    out = jax.block_until_ready(out)
    ref_out, _ = _reference_forward(inputs, hidden_states, params)
    assert out.shape == (batch_size, n_agents, 2 * n_net_outputs)
    assert jnp.allclose(out, ref_out, atol=1e-5, rtol=1e-5)
    assert hs.shape == hidden_states.shape

    # --- 2) multi-step grid with a ragged tail: m=150, tm=128 -> grid (2,) ---
    big_inputs = jax.random.normal(
        k_big, (50, n_agents, input_shape), dtype=jnp.float32
    )
    out2, _ = mlp_mean_log_std_agent_forward(
        big_inputs, hidden_states, params, tile_rows=128
    )
    out2 = jax.block_until_ready(out2)
    ref2, _ = _reference_forward(big_inputs, hidden_states, params)
    assert jnp.allclose(out2, ref2, atol=1e-5, rtol=1e-5)

    # --- 3) same batch, default tiling (single full-span non-128-multiple block) ---
    out3, _ = mlp_mean_log_std_agent_forward(big_inputs, hidden_states, params)
    out3 = jax.block_until_ready(out3)
    assert jnp.allclose(out3, ref2, atol=1e-5, rtol=1e-5)

    # --- 4) bf16 streams, f32 accumulation (relaxed tolerance) ---
    out4, _ = mlp_mean_log_std_agent_forward(
        big_inputs, hidden_states, params, tile_rows=128, use_bf16=True
    )
    out4 = jax.block_until_ready(out4)
    assert jnp.allclose(out4, ref2, atol=2e-2, rtol=2e-2)

    print("KERNEL_OK")
</pallas_src>

<mosaic_0001>
module attributes {stable_mosaic.version = 11 : i64} {
  func.func @_mlp_mean_log_std_kernel(%arg0: i32, %arg1: memref<16x6xf32, #tpu.memory_space<vmem>>, %arg2: memref<32x16xf32, #tpu.memory_space<vmem>>, %arg3: memref<32x1xf32, #tpu.memory_space<vmem>>, %arg4: memref<32x32xf32, #tpu.memory_space<vmem>>, %arg5: memref<32x1xf32, #tpu.memory_space<vmem>>, %arg6: memref<16x32xf32, #tpu.memory_space<vmem>>, %arg7: memref<16x1xf32, #tpu.memory_space<vmem>>, %arg8: memref<16x6xf32, #tpu.memory_space<vmem>>) attributes {dimension_semantics = [#tpu.dimension_semantics<parallel>], iteration_bounds = array<i64: 1>, scalar_prefetch = 0 : i64, scratch_operands = 0 : i64, tpu.core_type = #tpu.core_type<tc>, window_params = [{transform_indices = @transform_0, window_bounds = array<i64: 16, 6>}, {pipeline_mode = #tpu.pipeline_mode<synchronous>, transform_indices = @transform_1, window_bounds = array<i64: 32, 16>}, {pipeline_mode = #tpu.pipeline_mode<synchronous>, transform_indices = @transform_2, window_bounds = array<i64: 32, 1>}, {pipeline_mode = #tpu.pipeline_mode<synchronous>, transform_indices = @transform_3, window_bounds = array<i64: 32, 32>}, {pipeline_mode = #tpu.pipeline_mode<synchronous>, transform_indices = @transform_4, window_bounds = array<i64: 32, 1>}, {pipeline_mode = #tpu.pipeline_mode<synchronous>, transform_indices = @transform_5, window_bounds = array<i64: 16, 32>}, {pipeline_mode = #tpu.pipeline_mode<synchronous>, transform_indices = @transform_6, window_bounds = array<i64: 16, 1>}, {transform_indices = @transform_7, window_bounds = array<i64: 16, 6>}]} {
    %c0 = arith.constant 0 : index
    %c0_0 = arith.constant 0 : index
    %0 = vector.load %arg1[%c0, %c0_0] : memref<16x6xf32, #tpu.memory_space<vmem>>, vector<16x6xf32>
    %c0_1 = arith.constant 0 : index
    %c0_2 = arith.constant 0 : index
    %1 = vector.load %arg2[%c0_1, %c0_2] : memref<32x16xf32, #tpu.memory_space<vmem>>, vector<32x16xf32>
    %cst = arith.constant dense<0.000000e+00> : vector<32x6xf32>
    %2 = tpu.matmul %1, %0, %cst {dimension_numbers = #tpu.dot_dimension_numbers<[1], [0], [0], [1], [0, 0, 1, 1], [], []>} : vector<32x16xf32>, vector<16x6xf32>, vector<32x6xf32> -> vector<32x6xf32>
    %c0_3 = arith.constant 0 : index
    %c0_4 = arith.constant 0 : index
    %3 = vector.load %arg3[%c0_3, %c0_4] : memref<32x1xf32, #tpu.memory_space<vmem>>, vector<32x1xf32>
    %4 = vector.broadcast %3 : vector<32x1xf32> to vector<32x6xf32>
    %5 = arith.addf %2, %4 : vector<32x6xf32>
    %cst_5 = arith.constant 0.000000e+00 : f32
    %6 = vector.broadcast %cst_5 : f32 to vector<32x6xf32>
    %7 = arith.maximumf %5, %6 : vector<32x6xf32>
    %c0_6 = arith.constant 0 : index
    %c0_7 = arith.constant 0 : index
    %8 = vector.load %arg4[%c0_6, %c0_7] : memref<32x32xf32, #tpu.memory_space<vmem>>, vector<32x32xf32>
    %cst_8 = arith.constant dense<0.000000e+00> : vector<32x6xf32>
    %9 = tpu.matmul %8, %7, %cst_8 {dimension_numbers = #tpu.dot_dimension_numbers<[1], [0], [0], [1], [0, 0, 1, 1], [], []>} : vector<32x32xf32>, vector<32x6xf32>, vector<32x6xf32> -> vector<32x6xf32>
    %c0_9 = arith.constant 0 : index
    %c0_10 = arith.constant 0 : index
    %10 = vector.load %arg5[%c0_9, %c0_10] : memref<32x1xf32, #tpu.memory_space<vmem>>, vector<32x1xf32>
    %11 = vector.broadcast %10 : vector<32x1xf32> to vector<32x6xf32>
    %12 = arith.addf %9, %11 : vector<32x6xf32>
    %cst_11 = arith.constant 0.000000e+00 : f32
    %13 = vector.broadcast %cst_11 : f32 to vector<32x6xf32>
    %14 = arith.maximumf %12, %13 : vector<32x6xf32>
    %c0_12 = arith.constant 0 : index
    %c0_13 = arith.constant 0 : index
    %15 = vector.load %arg6[%c0_12, %c0_13] : memref<16x32xf32, #tpu.memory_space<vmem>>, vector<16x32xf32>
    %cst_14 = arith.constant dense<0.000000e+00> : vector<16x6xf32>
    %16 = tpu.matmul %15, %14, %cst_14 {dimension_numbers = #tpu.dot_dimension_numbers<[1], [0], [0], [1], [0, 0, 1, 1], [], []>} : vector<16x32xf32>, vector<32x6xf32>, vector<16x6xf32> -> vector<16x6xf32>
    %c0_15 = arith.constant 0 : index
    %c0_16 = arith.constant 0 : index
    %17 = vector.load %arg7[%c0_15, %c0_16] : memref<16x1xf32, #tpu.memory_space<vmem>>, vector<16x1xf32>
    %18 = vector.broadcast %17 : vector<16x1xf32> to vector<16x6xf32>
    %19 = arith.addf %16, %18 : vector<16x6xf32>
    %c0_17 = arith.constant 0 : index
    %c0_18 = arith.constant 0 : index
    %20 = vector.load %arg8[%c0_17, %c0_18] : memref<16x6xf32, #tpu.memory_space<vmem>>, vector<16x6xf32>
    tpu.vector_store %arg8[%c0_17, %c0_18], %19 {strides = array<i32>} : memref<16x6xf32, #tpu.memory_space<vmem>>, vector<16x6xf32>,
    return
  }
  func.func @transform_0(%arg0: i32) -> (i32, i32) {
    %c0_i32 = arith.constant 0 : i32
    %c0_i32_0 = arith.constant 0 : i32
    return %c0_i32, %arg0 : i32, i32
  }
  func.func @transform_1(%arg0: i32) -> (i32, i32) {
    %c0_i32 = arith.constant 0 : i32
    %c0_i32_0 = arith.constant 0 : i32
    %c0_i32_1 = arith.constant 0 : i32
    return %c0_i32, %c0_i32_0 : i32, i32
  }
  func.func @transform_2(%arg0: i32) -> (i32, i32) {
    %c0_i32 = arith.constant 0 : i32
    %c0_i32_0 = arith.constant 0 : i32
    %c0_i32_1 = arith.constant 0 : i32
    return %c0_i32, %c0_i32_0 : i32, i32
  }
  func.func @transform_3(%arg0: i32) -> (i32, i32) {
    %c0_i32 = arith.constant 0 : i32
    %c0_i32_0 = arith.constant 0 : i32
    %c0_i32_1 = arith.constant 0 : i32
    return %c0_i32, %c0_i32_0 : i32, i32
  }
  func.func @transform_4(%arg0: i32) -> (i32, i32) {
    %c0_i32 = arith.constant 0 : i32
    %c0_i32_0 = arith.constant 0 : i32
    %c0_i32_1 = arith.constant 0 : i32
    return %c0_i32, %c0_i32_0 : i32, i32
  }
  func.func @transform_5(%arg0: i32) -> (i32, i32) {
    %c0_i32 = arith.constant 0 : i32
    %c0_i32_0 = arith.constant 0 : i32
    %c0_i32_1 = arith.constant 0 : i32
    return %c0_i32, %c0_i32_0 : i32, i32
  }
  func.func @transform_6(%arg0: i32) -> (i32, i32) {
    %c0_i32 = arith.constant 0 : i32
    %c0_i32_0 = arith.constant 0 : i32
    %c0_i32_1 = arith.constant 0 : i32
    return %c0_i32, %c0_i32_0 : i32, i32
  }
  func.func @transform_7(%arg0: i32) -> (i32, i32) {
    %c0_i32 = arith.constant 0 : i32
    %c0_i32_0 = arith.constant 0 : i32
    return %c0_i32, %arg0 : i32, i32
  }
}

</mosaic_0001>

<bundles_post_ra>
// kernel: mlp_mean_log_std_agent_forward.1
= control target key start
LH: loop header
LB: loop body
LE: loop exit
PB: predicated region body
PF: predicated region fallthrough
CT: control target
= control target key end

     0   :  { %vm56_vm0 = vcmask 130048   ;;  %v458_v3 = vmov 0   ;;  %vm186_vm1 = vcmask 261120   ;;  %vm383_vm2 = vcmask 48128   ;;  %s581_s0 = inlined_call_operand.vmem [shape: f32[16,6], index: 0, kind: input, shape index: {}]   ;;  %s582_s1 = inlined_call_operand.vmem [shape: f32[32,16], index: 1, kind: input, shape index: {}]   ;;  %s583_s2 = inlined_call_operand.vmem [shape: f32[32,1], index: 2, kind: input, shape index: {}]   ;;  %s584_s4 = inlined_call_operand.vmem [shape: f32[32,1], index: 4, kind: input, shape index: {}]   ;;  %s585_s6 = inlined_call_operand.vmem [shape: f32[16,1], index: 6, kind: input, shape index: {}]   ;;  %s586_s3 = inlined_call_operand.vmem [shape: f32[32,32], index: 3, kind: input, shape index: {}]   ;;  %s587_s5 = inlined_call_operand.vmem [shape: f32[16,32], index: 5, kind: input, shape index: {}]   ;;  %s588_s7 = inlined_call_operand.vmem [shape: f32[16,6], index: 7, kind: output, shape index: {}]  }
   0x1   :  { %v27_v0 = vld [vmem:[%s581_s0 + $0x8] sm:$0xff]  ;;  %v26_v1 = vld [vmem:[%s581_s0] sm:$0xff]  ;;  %456 = vset.pattern.permute.xlu0 %v458_v3  ;;  %457 = vset.pattern.permute.xlu1 %v458_v3  ;;  %v35_v5 = vld [vmem:[%s583_s2 + $0x18] sm:$0xff] }
   0x2   :  { %v28_v2 = vld [vmem:[%s582_s1] sm:$0xff]  ;;  %420 = vmatprep.subr.mxu0 %v27_v0  ;;  %v29_v4 = vld [vmem:[%s582_s1 + $0x8] sm:$0xff]  ;;  %v30_v7 = vld [vmem:[%s582_s1 + $0x10] sm:$0xff]  ;;  %53 = vperm.xlu0 %456, %v35_v5  }
   0x3   :  { %424 = vmatprep.mubr.msk.f32.mxu0 %vm56_vm0, %v28_v2  ;;  %421 = vmatpush3.msra.mxu0 %v27_v0  ;;  %v33_v6 = vld [vmem:[%s583_s2 + $0x8] sm:$0xff]  ;;  %v34_v8 = vld [vmem:[%s583_s2 + $0x10] sm:$0xff]  ;;  %v32_v9 = vld [vmem:[%s583_s2] sm:$0xff] }
   0x4   :  { %422 = vmatprep.subr.mxu0 %v26_v1  ;;  %43 = vperm.xlu1 %457, %v33_v6   ;;  %v31_v10 = vld [vmem:[%s582_s1 + $0x18] sm:$0xff]  ;;  %v164_v12 = vld [vmem:[%s584_s4 + $0x10] sm:$0xff]  ;;  %v163_v13 = vld [vmem:[%s584_s4 + $0x8] sm:$0xff] }
   0x5   :  { %423 = vmatpush3.msra.mxu0 %v26_v1  ;;  %v165_v11 = vld [vmem:[%s584_s4 + $0x18] sm:$0xff]  ;;  %v162_v14 = vld [vmem:[%s584_s4] sm:$0xff]  ;;  %v291_v16 = vld [vmem:[%s585_s6 + $0x8] sm:$0xff] }
   0x6   :  { %425 = vmatmul.mubr.msk.f32.vlgmr.msra.gmra.mxu0 %vm56_vm0, %v29_v4  ;;  %48 = vperm.xlu0 %456, %v34_v8   ;;  %v290_v15 = vld [vmem:[%s585_s6] sm:$0xff]  ;;  %v159_v34 = vld [vmem:[%s586_s3 + $0x8] sm:$0xff]  ;;  %v160_v35 = vld [vmem:[%s586_s3 + $0x10] sm:$0xff] }
   0x7   :  { %427 = vmatprep.mubr.msk.f32.mxu0 %vm56_vm0, %v30_v7  ;;  %v158_v17 = vld [vmem:[%s586_s3] sm:$0xff]  ;;  %v161_v36 = vld [vmem:[%s586_s3 + $0x18] sm:$0xff]  ;;  %v289_v54 = vld [vmem:[%s587_s5 + $0x8] sm:$0xff] }
   0x8   :  { %38 = vperm.xlu1 %457, %v32_v9   ;;  %438 = vmatprep.mubr.msk.f32.mxu1 %vm186_vm1, %v158_v17  ;;  %v288_v37 = vld [vmem:[%s587_s5] sm:$0xff] }
   0xa   :  { %428 = vmatmul.mubr.msk.f32.gmra.mxu0 %vm56_vm0, %v31_v10  ;;  %183 = vperm.xlu0 %456, %v165_v11  }
   0xb   :  { %452 = vmatprep.mubr.msk.f32.mxu0 %vm186_vm1, %v288_v37 }
   0xc   :  { %178 = vperm.xlu1 %457, %v164_v12  }
   0xe   :  { %173 = vperm.xlu0 %456, %v163_v13  }
  0x10   :  { %168 = vperm.xlu1 %457, %v162_v14  }
  0x12   :  { %294 = vperm.xlu0 %456, %v290_v15  }
  0x14   :  { %299 = vperm.xlu1 %457, %v291_v16  }
  0x7d   :  { %v54_v18 = vpop.permute.xlu0 %53 }
  0x7f   :  { %v44_v20 = vpop.permute.xlu1 %43 }
  0x81   :  { %v49_v24 = vpop.permute.xlu0 %48 }
  0x83   :  { %v39_v29 = vpop.permute.xlu1 %38 }
  0x85   :  { %v184_v38 = vpop.permute.xlu0 %183 }
  0x87   :  { %v179_v40 = vpop.permute.xlu1 %178 }
  0x89   :  { %v174_v44 = vpop.permute.xlu0 %173 }
  0x8b   :  { %v169_v49 = vpop.permute.xlu1 %168 }
  0x8d   :  { %v295_v58 = vpop.permute.xlu0 %294 }
  0x8f   :  { %v300_v55 = vpop.permute.xlu1 %299 }
  0xc6   :  { %v426_v19 = vpop.f32.mrf.mxu0 }
  0xc7   :  { %v141_v26 = vadd.f32 %v426_v19, %v44_v20 }
  0xc8   :  { %v135_v21 = vpop.f32.mrf.mxu0 }
  0xc9   :  { %v136_v30 = vadd.f32 %v135_v21, %v39_v29  ;;  %v155_v32 = vmax.f32 %v141_v26, 0.0 }
  0xca   :  { %v429_v22 = vpop.f32.mrf.mxu0 }
  0xcb   :  { %v151_v23 = vadd.f32 %v429_v22, %v54_v18  ;;  %v154_v33 = vmax.f32 %v136_v30, 0.0 }
  0xcc   :  { %v145_v25 = vpop.f32.mrf.mxu0 }
  0xcd   :  { %v157_v27 = vmax.f32 %v151_v23, 0.0  ;;  %v146_v28 = vadd.f32 %v145_v25, %v49_v24 }
  0xcf   :  { %v156_v31 = vmax.f32 %v146_v28, 0.0  ;;  %430 = vmatprep.subr.mxu1 %v157_v27 }
  0xd0   :  { %431 = vmatpush3.msra.mxu1 %v157_v27 }
  0xd1   :  { %432 = vmatprep.subr.mxu1 %v156_v31 }
  0xd2   :  { %433 = vmatpush3.msra.mxu1 %v156_v31 }
  0xd3   :  { %434 = vmatprep.subr.mxu1 %v155_v32 }
  0xd4   :  { %435 = vmatpush3.msra.mxu1 %v155_v32 }
  0xd5   :  { %436 = vmatprep.subr.mxu1 %v154_v33 }
  0xd6   :  { %437 = vmatpush3.msra.mxu1 %v154_v33 }
  0xd7   :  { %439 = vmatmul.mubr.msk.f32.vlgmr.msra.gmra.mxu1 %vm186_vm1, %v159_v34 }
  0xd8   :  { %441 = vmatprep.mubr.msk.f32.mxu1 %vm186_vm1, %v160_v35 }
  0xdb   :  { %442 = vmatmul.mubr.msk.f32.gmra.mxu1 %vm186_vm1, %v161_v36 }
 0x197   :  { %v440_v39 = vpop.f32.mrf.mxu1 }
 0x198   :  { %v271_v46 = vadd.f32 %v440_v39, %v174_v44 }
 0x199   :  { %v265_v41 = vpop.f32.mrf.mxu1 }
 0x19a   :  { %v266_v50 = vadd.f32 %v265_v41, %v169_v49  ;;  %v285_v52 = vmax.f32 %v271_v46, 0.0 }
 0x19b   :  { %v443_v42 = vpop.f32.mrf.mxu1 }
 0x19c   :  { %v281_v43 = vadd.f32 %v443_v42, %v184_v38  ;;  %v284_v53 = vmax.f32 %v266_v50, 0.0 }
 0x19d   :  { %v275_v45 = vpop.f32.mrf.mxu1 }
 0x19e   :  { %v287_v47 = vmax.f32 %v281_v43, 0.0  ;;  %v276_v48 = vadd.f32 %v275_v45, %v179_v40 }
 0x1a0   :  { %v286_v51 = vmax.f32 %v276_v48, 0.0  ;;  %444 = vmatprep.subr.mxu0 %v287_v47 }
 0x1a1   :  { %445 = vmatpush3.msra.mxu0 %v287_v47 }
 0x1a2   :  { %446 = vmatprep.subr.mxu0 %v286_v51 }
 0x1a3   :  { %447 = vmatpush3.msra.mxu0 %v286_v51 }
 0x1a4   :  { %448 = vmatprep.subr.mxu0 %v285_v52 }
 0x1a5   :  { %449 = vmatpush3.msra.mxu0 %v285_v52 }
 0x1a6   :  { %450 = vmatprep.subr.mxu0 %v284_v53 }
 0x1a7   :  { %451 = vmatpush3.msra.mxu0 %v284_v53 }
 0x1a8   :  { %453 = vmatmul.mubr.msk.f32.vlgmr.msra.gmra.mxu0 %vm186_vm1, %v289_v54 }
 0x268   :  { %v454_v56 = vpop.f32.mrf.mxu0 }
 0x269   :  { %v380_v57 = vadd.f32 %v454_v56, %v300_v55 }
 0x26a   :  { %v374_v59 = vpop.f32.mrf.mxu0 }
 0x26b   :  { %385 = vst.msk [vmem:[%s588_s7 + $0x8] sm:$0xff] %vm383_vm2, %v380_v57  ;;  %v375_v60 = vadd.f32 %v374_v59, %v295_v58 }
 0x26d   :  { %384 = vst.msk [vmem:[%s588_s7] sm:$0xff] %vm383_vm2, %v375_v60 }

</bundles_post_ra>
